<compile_context>
chip_gen: v6e
topology: v6e:2x2x1
jax: 0.10.0
libtpu: 0.0.40
codegen_flags: <defaults>
</compile_context>

<pallas_src>
import jax
import jax.numpy as jnp
from jax.experimental import pallas as pl
from jax.experimental.pallas import tpu as pltpu

# Stand-in for the external VGG_LAYERS_POSE constant (ints = 1x1 conv width, 'M' = maxpool).
VGG_LAYERS_POSE = [32, 32, 'M', 64, 'M']
IN_CHANNELS = 17
BN_EPS = 1e-5


def _choose_btile(n, cap=32):
    """Largest divisor of n that is <= cap, preferring >=2 grid steps (v7x megacore).

    cap=32 keeps the per-step block (input + double buffer + live intermediates) well
    under the v5e 16 MiB scoped-VMEM default.
    """
    divisors = [d for d in range(1, n + 1) if n % d == 0 and d <= cap]
    multi = [d for d in divisors if n // d >= 2]
    return max(multi if multi else divisors)


def _pool_major_layout(x, n_pools):
    """(N,H,W,C) -> (4**P, N, (H>>P)*(W>>P), C) with pool bits (finest level first) outermost.

    Pure reshape+transpose (no gather): the 4 members of every level-l 2x2 maxpool
    window end up at the same offset in 4 equal leading-dim groups, so each in-kernel
    pool is a pairwise VPU max after a tile-aligned reshape.
    """
    N, H, W, C = x.shape
    P = n_pools
    Hs, Ws = H >> P, W >> P
    x = x.reshape((N, Hs) + (2,) * P + (Ws,) + (2,) * P + (C,))
    # axes after reshape: N=0, hk=1, h_P..h_1 = 2..1+P, wk=2+P, w_P..w_1 = 3+P..2+2P, C=3+2P
    perm = []
    for l in range(1, P + 1):                      # level-1 (finest) pool bits outermost
        perm += [2 + P - l, 3 + 2 * P - l]         # (h_l, w_l)
    perm += [0, 1, 2 + P, 3 + 2 * P]               # N, hk, wk, C
    return x.transpose(perm).reshape(4 ** P, N, Hs * Ws, C)


# ---------------------------------------------------------------------------
# Fused kernel: all conv+BN+ReLU layers, both maxpools, global avg-pool.
# One grid step == B_TILE batch samples; activations never leave VMEM.
# ---------------------------------------------------------------------------
def _make_fused_kernel(config, btile, groups, sw, c_in):
    def kernel(x_ref, *refs):
        o_ref = refs[-1]
        wrefs = refs[:-1]                              # (w, b) pairs per conv layer
        # (4**P, B_TILE, Hs*Ws, Cin) -> (rows, Cin); every merged leading chunk is a
        # multiple of 8 rows, so the reshape is layout-free.
        h = x_ref[...].reshape(groups * btile * sw, c_in)
        li = 0
        for op in config:
            if op == 'M':
                R, C = h.shape
                hr = h.reshape(4, R // 4, C)           # tile-aligned split (R//4 % 8 == 0)
                # 2x2 maxpool == pairwise VPU max over 4 leading-dim groups
                h = jnp.maximum(jnp.maximum(hr[0], hr[1]),
                                jnp.maximum(hr[2], hr[3]))
            else:
                w = wrefs[2 * li][...]                 # (Cin, Cout), BN scale folded in
                b = wrefs[2 * li + 1][...]             # (1, Cout), conv bias + BN shift
                y = jnp.dot(h, w, preferred_element_type=jnp.float32) + b
                h = jnp.maximum(y, 0.0)                # ReLU
                li += 1
        # AdaptiveAvgPool2d((1,1)) + flatten == per-sample mean over remaining rows.
        C = h.shape[-1]
        hb = h.reshape(btile, sw, C)                   # sw % 8 == 0 -> layout-free
        o_ref[0] = (jnp.sum(hb, axis=1) * (1.0 / sw)).astype(o_ref.dtype)
    return kernel


def vgg_block_pose_forward(pose_nhwc, params, *, b_tile=None):
    config = params['config']
    conv_w = params['conv_w']
    conv_b = params['conv_b']
    c_in = conv_w[0].shape[0]
    c_final = conv_w[-1].shape[1]

    N, H, W, Cin = pose_nhwc.shape
    assert Cin == c_in, (Cin, c_in)
    P = sum(1 for op in config if op == 'M')
    assert H % (1 << P) == 0 and W % (1 << P) == 0, "spatial dims must be pool-divisible"
    sw = (H >> P) * (W >> P)
    assert sw % 8 == 0, "final spatial size must keep in-kernel reshapes tile-aligned"
    G = 4 ** P

    if b_tile is None:
        b_tile = _choose_btile(N)
    assert N % b_tile == 0, "batch must be divisible by b_tile"
    grid = (N // b_tile,)

    # One-shot wrapper prep: cast + static transpose (fuses in XLA; no gather, no pad).
    x = _pool_major_layout(pose_nhwc.astype(jnp.float32), P)      # (G, N, sw, Cin)

    in_specs = [pl.BlockSpec((G, b_tile, sw, Cin), lambda b: (0, b, 0, 0))]
    operands = [x]
    for w, bia in zip(conv_w, conv_b):
        in_specs.append(pl.BlockSpec(w.shape, lambda b: (0, 0)))   # weights resident in VMEM
        in_specs.append(pl.BlockSpec(bia.shape, lambda b: (0, 0)))
        operands.extend([w, bia])

    # Advisory cost estimate (real flops / HBM bytes) for XLA scheduling.
    rows, cin, flops = H * W, Cin, 0
    for op in config:
        if op == 'M':
            rows //= 4
        else:
            flops += 2 * rows * cin * int(op)
            cin = int(op)
    flops *= N
    param_bytes = sum(int(w.size + bb.size) for w, bb in zip(conv_w, conv_b)) * 4
    bytes_accessed = int(x.size) * 4 + param_bytes + N * c_final * 4

    out = pl.pallas_call(
        _make_fused_kernel(config, b_tile, G, sw, c_in),
        out_shape=jax.ShapeDtypeStruct((N // b_tile, b_tile, c_final), jnp.float32),
        grid=grid,
        in_specs=in_specs,
        out_specs=pl.BlockSpec((1, b_tile, c_final), lambda b: (b, 0, 0)),
        compiler_params=pltpu.CompilerParams(dimension_semantics=("parallel",)),
        cost_estimate=pl.CostEstimate(flops=flops, transcendentals=0,
                                      bytes_accessed=bytes_accessed),
    )(*operands)
    return out.reshape(N, c_final)


# ---------------------------------------------------------------------------
# Deterministic parameter init: Conv2d(1x1) + eval-mode BatchNorm folded into
# a single (Cin, Cout) weight and (1, Cout) bias per conv layer.
# ---------------------------------------------------------------------------
def init_params(key, in_channels=IN_CHANNELS, config=VGG_LAYERS_POSE):
    conv_w, conv_b = [], []
    cin = in_channels
    for op in config:
        if op == 'M':
            continue
        cout = int(op)
        key, kw, kb, kg, kbe, km, kv = jax.random.split(key, 7)
        w = jax.random.normal(kw, (cout, cin), jnp.float32) * 0.05   # Conv2d weight (Cout,Cin,1,1)
        b = jax.random.normal(kb, (cout,), jnp.float32) * 0.05       # Conv2d bias
        gamma = 1.0 + 0.1 * jax.random.normal(kg, (cout,), jnp.float32)
        beta = 0.1 * jax.random.normal(kbe, (cout,), jnp.float32)
        mean = 0.1 * jax.random.normal(km, (cout,), jnp.float32)
        var = jax.random.uniform(kv, (cout,), jnp.float32, minval=0.5, maxval=1.5)
        scale = gamma / jnp.sqrt(var + BN_EPS)          # eval-mode BN fold
        conv_w.append(jnp.transpose(w) * scale[None, :])             # (Cin, Cout)
        conv_b.append((beta + (b - mean) * scale).reshape(1, cout))  # conv bias + BN shift
        cin = cout
    return {'config': tuple(config), 'conv_w': conv_w, 'conv_b': conv_b}


# Pure-JAX reference (plain NHWC pipeline, same folded params) for correctness.
def _reference(pose_nhwc, params):
    x = pose_nhwc.astype(jnp.float32)
    li = 0
    for op in params['config']:
        if op == 'M':
            N, H, W, C = x.shape
            x = x.reshape(N, H // 2, 2, W // 2, 2, C).max(axis=(2, 4))
        else:
            w = params['conv_w'][li]
            b = params['conv_b'][li]
            x = jnp.maximum(
                jnp.einsum('nhwc,cd->nhwd', x, w,
                           precision=jax.lax.Precision.HIGHEST) + b, 0.0)
            li += 1
    return x.mean(axis=(1, 2))


if __name__ == "__main__":
    key = jax.random.PRNGKey(0)
    kx, kp = jax.random.split(key)
    # batch=2, H=W=16, in_channels=17 (channels-last input, as the module's forward expects)
    pose = jax.random.normal(kx, (2, 16, 16, IN_CHANNELS), jnp.float32)
    params = init_params(kp)

    fwd = jax.jit(lambda x: vgg_block_pose_forward(x, params))
    out = jax.block_until_ready(fwd(pose))

    final_channels = [c for c in VGG_LAYERS_POSE if c != 'M'][-1]
    assert out.shape == (2, final_channels), out.shape
    assert out.dtype == jnp.float32
    assert bool(jnp.all(jnp.isfinite(out)))

    ref = _reference(pose, params)
    assert bool(jnp.allclose(out, ref, rtol=1e-4, atol=1e-5)), (out, ref)

    print("KERNEL_OK")
</pallas_src>

<mosaic_0001>
module attributes {stable_mosaic.version = 11 : i64} {
  func.func @kernel(%arg0: i32, %arg1: memref<16x1x16x17xf32, #tpu.memory_space<vmem>>, %arg2: memref<17x32xf32, #tpu.memory_space<vmem>>, %arg3: memref<1x32xf32, #tpu.memory_space<vmem>>, %arg4: memref<32x32xf32, #tpu.memory_space<vmem>>, %arg5: memref<1x32xf32, #tpu.memory_space<vmem>>, %arg6: memref<32x64xf32, #tpu.memory_space<vmem>>, %arg7: memref<1x64xf32, #tpu.memory_space<vmem>>, %arg8: memref<1x1x64xf32, #tpu.memory_space<vmem>>) attributes {dimension_semantics = [#tpu.dimension_semantics<parallel>], iteration_bounds = array<i64: 2>, scalar_prefetch = 0 : i64, scratch_operands = 0 : i64, tpu.core_type = #tpu.core_type<tc>, window_params = [{transform_indices = @transform_0, window_bounds = array<i64: 16, 1, 16, 17>}, {pipeline_mode = #tpu.pipeline_mode<synchronous>, transform_indices = @transform_1, window_bounds = array<i64: 17, 32>}, {pipeline_mode = #tpu.pipeline_mode<synchronous>, transform_indices = @transform_2, window_bounds = array<i64: 1, 32>}, {pipeline_mode = #tpu.pipeline_mode<synchronous>, transform_indices = @transform_3, window_bounds = array<i64: 32, 32>}, {pipeline_mode = #tpu.pipeline_mode<synchronous>, transform_indices = @transform_4, window_bounds = array<i64: 1, 32>}, {pipeline_mode = #tpu.pipeline_mode<synchronous>, transform_indices = @transform_5, window_bounds = array<i64: 32, 64>}, {pipeline_mode = #tpu.pipeline_mode<synchronous>, transform_indices = @transform_6, window_bounds = array<i64: 1, 64>}, {transform_indices = @transform_7, window_bounds = array<i64: 1, 1, 64>}]} {
    %c0 = arith.constant 0 : index
    %c0_0 = arith.constant 0 : index
    %c0_1 = arith.constant 0 : index
    %c0_2 = arith.constant 0 : index
    %0 = vector.load %arg1[%c0, %c0_0, %c0_1, %c0_2] : memref<16x1x16x17xf32, #tpu.memory_space<vmem>>, vector<16x1x16x17xf32>
    %1 = vector.shape_cast %0 : vector<16x1x16x17xf32> to vector<256x17xf32>
    %c0_3 = arith.constant 0 : index
    %c0_4 = arith.constant 0 : index
    %2 = vector.load %arg2[%c0_3, %c0_4] : memref<17x32xf32, #tpu.memory_space<vmem>>, vector<17x32xf32>
    %c0_5 = arith.constant 0 : index
    %c0_6 = arith.constant 0 : index
    %3 = vector.load %arg3[%c0_5, %c0_6] : memref<1x32xf32, #tpu.memory_space<vmem>>, vector<1x32xf32>
    %cst = arith.constant dense<0.000000e+00> : vector<256x32xf32>
    %4 = tpu.matmul %1, %2, %cst {dimension_numbers = #tpu.dot_dimension_numbers<[1], [0], [0], [1], [0, 0, 1, 1], [], []>} : vector<256x17xf32>, vector<17x32xf32>, vector<256x32xf32> -> vector<256x32xf32>
    %5 = vector.broadcast %3 : vector<1x32xf32> to vector<256x32xf32>
    %6 = arith.addf %4, %5 : vector<256x32xf32>
    %cst_7 = arith.constant 0.000000e+00 : f32
    %7 = vector.broadcast %cst_7 : f32 to vector<256x32xf32>
    %8 = arith.maximumf %6, %7 : vector<256x32xf32>
    %c0_8 = arith.constant 0 : index
    %c0_9 = arith.constant 0 : index
    %9 = vector.load %arg4[%c0_8, %c0_9] : memref<32x32xf32, #tpu.memory_space<vmem>>, vector<32x32xf32>
    %c0_10 = arith.constant 0 : index
    %c0_11 = arith.constant 0 : index
    %10 = vector.load %arg5[%c0_10, %c0_11] : memref<1x32xf32, #tpu.memory_space<vmem>>, vector<1x32xf32>
    %cst_12 = arith.constant dense<0.000000e+00> : vector<256x32xf32>
    %11 = tpu.matmul %8, %9, %cst_12 {dimension_numbers = #tpu.dot_dimension_numbers<[1], [0], [0], [1], [0, 0, 1, 1], [], []>} : vector<256x32xf32>, vector<32x32xf32>, vector<256x32xf32> -> vector<256x32xf32>
    %12 = vector.broadcast %10 : vector<1x32xf32> to vector<256x32xf32>
    %13 = arith.addf %11, %12 : vector<256x32xf32>
    %cst_13 = arith.constant 0.000000e+00 : f32
    %14 = vector.broadcast %cst_13 : f32 to vector<256x32xf32>
    %15 = arith.maximumf %13, %14 : vector<256x32xf32>
    %16 = vector.shape_cast %15 : vector<256x32xf32> to vector<4x64x32xf32>
    %17 = vector.extract_strided_slice %16 {offsets = [0, 0, 0], sizes = [1, 64, 32], strides = [1, 1, 1]} : vector<4x64x32xf32> to vector<1x64x32xf32>
    %18 = vector.shape_cast %17 : vector<1x64x32xf32> to vector<64x32xf32>
    %19 = vector.extract_strided_slice %16 {offsets = [1, 0, 0], sizes = [1, 64, 32], strides = [1, 1, 1]} : vector<4x64x32xf32> to vector<1x64x32xf32>
    %20 = vector.shape_cast %19 : vector<1x64x32xf32> to vector<64x32xf32>
    %21 = arith.maximumf %18, %20 : vector<64x32xf32>
    %22 = vector.extract_strided_slice %16 {offsets = [2, 0, 0], sizes = [1, 64, 32], strides = [1, 1, 1]} : vector<4x64x32xf32> to vector<1x64x32xf32>
    %23 = vector.shape_cast %22 : vector<1x64x32xf32> to vector<64x32xf32>
    %24 = vector.extract_strided_slice %16 {offsets = [3, 0, 0], sizes = [1, 64, 32], strides = [1, 1, 1]} : vector<4x64x32xf32> to vector<1x64x32xf32>
    %25 = vector.shape_cast %24 : vector<1x64x32xf32> to vector<64x32xf32>
    %26 = arith.maximumf %23, %25 : vector<64x32xf32>
    %27 = arith.maximumf %21, %26 : vector<64x32xf32>
    %c0_14 = arith.constant 0 : index
    %c0_15 = arith.constant 0 : index
    %28 = vector.load %arg6[%c0_14, %c0_15] : memref<32x64xf32, #tpu.memory_space<vmem>>, vector<32x64xf32>
    %c0_16 = arith.constant 0 : index
    %c0_17 = arith.constant 0 : index
    %29 = vector.load %arg7[%c0_16, %c0_17] : memref<1x64xf32, #tpu.memory_space<vmem>>, vector<1x64xf32>
    %cst_18 = arith.constant dense<0.000000e+00> : vector<64x64xf32>
    %30 = tpu.matmul %27, %28, %cst_18 {dimension_numbers = #tpu.dot_dimension_numbers<[1], [0], [0], [1], [0, 0, 1, 1], [], []>} : vector<64x32xf32>, vector<32x64xf32>, vector<64x64xf32> -> vector<64x64xf32>
    %31 = vector.broadcast %29 : vector<1x64xf32> to vector<64x64xf32>
    %32 = arith.addf %30, %31 : vector<64x64xf32>
    %cst_19 = arith.constant 0.000000e+00 : f32
    %33 = vector.broadcast %cst_19 : f32 to vector<64x64xf32>
    %34 = arith.maximumf %32, %33 : vector<64x64xf32>
    %35 = vector.shape_cast %34 : vector<64x64xf32> to vector<4x16x64xf32>
    %36 = vector.extract_strided_slice %35 {offsets = [0, 0, 0], sizes = [1, 16, 64], strides = [1, 1, 1]} : vector<4x16x64xf32> to vector<1x16x64xf32>
    %37 = vector.shape_cast %36 : vector<1x16x64xf32> to vector<16x64xf32>
    %38 = vector.extract_strided_slice %35 {offsets = [1, 0, 0], sizes = [1, 16, 64], strides = [1, 1, 1]} : vector<4x16x64xf32> to vector<1x16x64xf32>
    %39 = vector.shape_cast %38 : vector<1x16x64xf32> to vector<16x64xf32>
    %40 = arith.maximumf %37, %39 : vector<16x64xf32>
    %41 = vector.extract_strided_slice %35 {offsets = [2, 0, 0], sizes = [1, 16, 64], strides = [1, 1, 1]} : vector<4x16x64xf32> to vector<1x16x64xf32>
    %42 = vector.shape_cast %41 : vector<1x16x64xf32> to vector<16x64xf32>
    %43 = vector.extract_strided_slice %35 {offsets = [3, 0, 0], sizes = [1, 16, 64], strides = [1, 1, 1]} : vector<4x16x64xf32> to vector<1x16x64xf32>
    %44 = vector.shape_cast %43 : vector<1x16x64xf32> to vector<16x64xf32>
    %45 = arith.maximumf %42, %44 : vector<16x64xf32>
    %46 = arith.maximumf %40, %45 : vector<16x64xf32>
    %47 = vector.shape_cast %46 : vector<16x64xf32> to vector<1x16x64xf32>
    %cst_20 = arith.constant dense<0.000000e+00> : vector<1x64xf32>
    %48 = vector.multi_reduction <add>, %47, %cst_20 [1] : vector<1x16x64xf32> to vector<1x64xf32>
    %cst_21 = arith.constant 6.250000e-02 : f32
    %49 = vector.broadcast %cst_21 : f32 to vector<1x64xf32>
    %50 = arith.mulf %48, %49 : vector<1x64xf32>
    %c0_22 = arith.constant 0 : index
    %c0_23 = arith.constant 0 : index
    %c0_24 = arith.constant 0 : index
    %51 = vector.load %arg8[%c0_22, %c0_23, %c0_24] : memref<1x1x64xf32, #tpu.memory_space<vmem>>, vector<1x1x64xf32>
    %52 = vector.shape_cast %51 : vector<1x1x64xf32> to vector<1x64xf32>
    %53 = vector.shape_cast %50 : vector<1x64xf32> to vector<1x1x64xf32>
    tpu.vector_store %arg8[%c0_22, %c0_23, %c0_24], %53 {strides = array<i32>} : memref<1x1x64xf32, #tpu.memory_space<vmem>>, vector<1x1x64xf32>,
    return
  }
  func.func @transform_0(%arg0: i32) -> (i32, i32, i32, i32) {
    %c0_i32 = arith.constant 0 : i32
    %c0_i32_0 = arith.constant 0 : i32
    %c0_i32_1 = arith.constant 0 : i32
    %c0_i32_2 = arith.constant 0 : i32
    return %c0_i32, %arg0, %c0_i32_0, %c0_i32_1 : i32, i32, i32, i32
  }
  func.func @transform_1(%arg0: i32) -> (i32, i32) {
    %c0_i32 = arith.constant 0 : i32
    %c0_i32_0 = arith.constant 0 : i32
    %c0_i32_1 = arith.constant 0 : i32
    return %c0_i32, %c0_i32_0 : i32, i32
  }
  func.func @transform_2(%arg0: i32) -> (i32, i32) {
    %c0_i32 = arith.constant 0 : i32
    %c0_i32_0 = arith.constant 0 : i32
    %c0_i32_1 = arith.constant 0 : i32
    return %c0_i32, %c0_i32_0 : i32, i32
  }
  func.func @transform_3(%arg0: i32) -> (i32, i32) {
    %c0_i32 = arith.constant 0 : i32
    %c0_i32_0 = arith.constant 0 : i32
    %c0_i32_1 = arith.constant 0 : i32
    return %c0_i32, %c0_i32_0 : i32, i32
  }
  func.func @transform_4(%arg0: i32) -> (i32, i32) {
    %c0_i32 = arith.constant 0 : i32
    %c0_i32_0 = arith.constant 0 : i32
    %c0_i32_1 = arith.constant 0 : i32
    return %c0_i32, %c0_i32_0 : i32, i32
  }
  func.func @transform_5(%arg0: i32) -> (i32, i32) {
    %c0_i32 = arith.constant 0 : i32
    %c0_i32_0 = arith.constant 0 : i32
    %c0_i32_1 = arith.constant 0 : i32
    return %c0_i32, %c0_i32_0 : i32, i32
  }
  func.func @transform_6(%arg0: i32) -> (i32, i32) {
    %c0_i32 = arith.constant 0 : i32
    %c0_i32_0 = arith.constant 0 : i32
    %c0_i32_1 = arith.constant 0 : i32
    return %c0_i32, %c0_i32_0 : i32, i32
  }
  func.func @transform_7(%arg0: i32) -> (i32, i32, i32) {
    %c0_i32 = arith.constant 0 : i32
    %c0_i32_0 = arith.constant 0 : i32
    %c0_i32_1 = arith.constant 0 : i32
    return %arg0, %c0_i32, %c0_i32_0 : i32, i32, i32
  }
}

</mosaic_0001>

<bundles_post_ra>
// kernel: _lambda_.1
= control target key start
LH: loop header
LB: loop body
LE: loop exit
PB: predicated region body
PF: predicated region fallthrough
CT: control target
= control target key end

     0   :  { %12 = vsyncpa [#allocation4], 0  ;;  %s2322_s0 = inlined_call_operand.vmem [shape: f32[16,2,16,17], index: 0, kind: input, shape index: {}]   ;;  %s2323_s1 = inlined_call_operand.vmem [shape: f32[17,32], index: 1, kind: input, shape index: {}]   ;;  %s2324_s2 = inlined_call_operand.vmem [shape: f32[1,32], index: 2, kind: input, shape index: {}]   ;;  %s2325_s3 = inlined_call_operand.vmem [shape: f32[32,32], index: 3, kind: input, shape index: {}]   ;;  %s2326_s4 = inlined_call_operand.vmem [shape: f32[1,32], index: 4, kind: input, shape index: {}]   ;;  %s2327_s5 = inlined_call_operand.vmem [shape: f32[32,64], index: 5, kind: input, shape index: {}]   ;;  %s2328_s6 = inlined_call_operand.vmem [shape: f32[1,64], index: 6, kind: input, shape index: {}]   ;;  %s2329_s7 = inlined_call_operand.hbm [shape: f32[2,1,64], index: 7, kind: output, shape index: {}]  }
   0x1   :  { %14 = vsyncpa [#allocation4 + $0x1], 0  ;;  %s1915_s24 = smov 0   ;;  %s1917_s25 = smov 0  }
   0x2   :  { %s1919_s26 = smov 0   ;;  %s1921_s27 = smov 0  }
   0x3 LB: > { %s1465_s28 = sadd.s32 4294967295, %s1872_s27   ;;  %s1466_s29 = sadd.s32 4294967294, %s1872_s27   ;;  %s1872_s27 = sphi %s1921_s27, %s2337_s27   ;;  %s1868_s26 = sphi %s1919_s26, %s2336_s26   ;;  %s1864_s25 = sphi %s1917_s25, %s2335_s25   ;;  %s1860_s24 = sphi %s1915_s24, %s2334_s24  }
   0x4   : > { %s1938_s30 = sadd.s32 1, %s1872_s27   ;;  %s27_s8 = sadd.s32 1, %s1868_s26 }
   0x5   : > { %s24_s9 = ssub.s32 %s1872_s27, %s1938_s30  ;;  %p34_p0 = scmp.ne.s32.totalorder %s1868_s26, %s1864_s25 }
   0x6   : > { %p25_p1 = scmp.eq.s32.totalorder %s24_s9, 0  ;;  %p35_p2 = scmp.eq.s32.totalorder %s1872_s27, 0 }
   0x7   : > { %p190_p3 = scmp.eq.s32.totalorder %s1465_s28, 1  ;;  %p195_p4 = scmp.ne.s32.totalorder %s1864_s25, %s1860_s24 }
   0x8   : > { %s1951_s10 = scalar_select %p25_p1, %s1868_s26, %s27_s8  }
   0x9   : > { %p36_p5 = por %p35_p2, %p34_p0  ;;  %p1953_p6 = por %p190_p3, %p34_p0 }
   0xa   : > { %p196_p7 = scmp.eq.s32.totalorder %s1466_s29, 1  ;;  %p2330_p9 = scmp.ge.s32.totalorder %s1872_s27, 2 }
   0xc   : > { %p1957_p8 = por %p196_p7, %p195_p4  ;;  %230 = sbr.rel (%p2330_p9) target bundleno = 37 (0x25), region = 40 }
  0x11   : > { %233 = sbr.rel (!%p36_p5) target bundleno = 37 (0x25), region = 44  ;;  %s235_s13 = sand.u32 (%p36_p5), 1, %s1868_s26  }
  0x12   : > { %s1553_s14 = sshll.u32 (%p36_p5), %s1872_s27, 4  ;;  %s1469_s15 = sshll.u32 (%p36_p5), %s235_s13, 8 }
  0x13   : > { %s1969_s18 = scalar_lea.vmem (%p36_p5), %s2322_s0, %s1553_s14  ;;  %s1974_s19 = scalar_lea.vmem (%p36_p5), [#allocation2], %s1469_s15 }
  0x14   : > { %v331_v0 = vld [vmem:[%s1969_s18] sm:$0xff] (%p36_p5)  ;;  %v333_v1 = vld [vmem:[%s1969_s18 + $0x8] sm:$0xff] (%p36_p5) }
  0x15   : > { %v335_v2 = vld [vmem:[%s1969_s18 + $0x20] sm:$0xff] (%p36_p5)  ;;  %332 = vst [vmem:[%s1974_s19] sm:$0xff] (%p36_p5), %v331_v0  ;;  %334 = vst [vmem:[%s1974_s19 + $0x8] sm:$0xff] (%p36_p5), %v333_v1  ;;  %v337_v3 = vld [vmem:[%s1969_s18 + $0x28] sm:$0xff] (%p36_p5) }
  0x16   : > { %336 = vst [vmem:[%s1974_s19 + $0x10] sm:$0xff] %v335_v2  ;;  %v339_v4 = vld [vmem:[%s1969_s18 + $0x40] sm:$0xff]  ;;  %v341_v5 = vld [vmem:[%s1969_s18 + $0x48] sm:$0xff]  ;;  %338 = vst [vmem:[%s1974_s19 + $0x18] sm:$0xff] %v337_v3 }
  0x17   : > { %340 = vst [vmem:[%s1974_s19 + $0x20] sm:$0xff] %v339_v4  ;;  %342 = vst [vmem:[%s1974_s19 + $0x28] sm:$0xff] %v341_v5  ;;  %v343_v6 = vld [vmem:[%s1969_s18 + $0x60] sm:$0xff]  ;;  %v345_v7 = vld [vmem:[%s1969_s18 + $0x68] sm:$0xff] }
  0x18   : > { %v347_v8 = vld [vmem:[%s1969_s18 + $0x80] sm:$0xff]  ;;  %344 = vst [vmem:[%s1974_s19 + $0x30] sm:$0xff] %v343_v6  ;;  %346 = vst [vmem:[%s1974_s19 + $0x38] sm:$0xff] %v345_v7  ;;  %v349_v9 = vld [vmem:[%s1969_s18 + $0x88] sm:$0xff] }
  0x19   : > { %348 = vst [vmem:[%s1974_s19 + $0x40] sm:$0xff] %v347_v8  ;;  %v351_v10 = vld [vmem:[%s1969_s18 + $0xa0] sm:$0xff]  ;;  %v353_v11 = vld [vmem:[%s1969_s18 + $0xa8] sm:$0xff]  ;;  %350 = vst [vmem:[%s1974_s19 + $0x48] sm:$0xff] %v349_v9 }
  0x1a   : > { %352 = vst [vmem:[%s1974_s19 + $0x50] sm:$0xff] %v351_v10  ;;  %354 = vst [vmem:[%s1974_s19 + $0x58] sm:$0xff] %v353_v11  ;;  %v355_v12 = vld [vmem:[%s1969_s18 + $0xc0] sm:$0xff]  ;;  %v357_v13 = vld [vmem:[%s1969_s18 + $0xc8] sm:$0xff] }
  0x1b   : > { %v359_v14 = vld [vmem:[%s1969_s18 + $0xe0] sm:$0xff]  ;;  %356 = vst [vmem:[%s1974_s19 + $0x60] sm:$0xff] %v355_v12  ;;  %358 = vst [vmem:[%s1974_s19 + $0x68] sm:$0xff] %v357_v13  ;;  %v361_v15 = vld [vmem:[%s1969_s18 + $0xe8] sm:$0xff] }
  0x1c   : > { %360 = vst [vmem:[%s1974_s19 + $0x70] sm:$0xff] %v359_v14  ;;  %v363_v16 = vld [vmem:[%s1969_s18 + $0x100] sm:$0xff]  ;;  %v365_v17 = vld [vmem:[%s1969_s18 + $0x108] sm:$0xff]  ;;  %362 = vst [vmem:[%s1974_s19 + $0x78] sm:$0xff] %v361_v15 }
  0x1d   : > { %364 = vst [vmem:[%s1974_s19 + $0x80] sm:$0xff] %v363_v16  ;;  %366 = vst [vmem:[%s1974_s19 + $0x88] sm:$0xff] %v365_v17  ;;  %v367_v18 = vld [vmem:[%s1969_s18 + $0x120] sm:$0xff]  ;;  %v369_v19 = vld [vmem:[%s1969_s18 + $0x128] sm:$0xff] }
  0x1e   : > { %v371_v20 = vld [vmem:[%s1969_s18 + $0x140] sm:$0xff]  ;;  %368 = vst [vmem:[%s1974_s19 + $0x90] sm:$0xff] %v367_v18  ;;  %370 = vst [vmem:[%s1974_s19 + $0x98] sm:$0xff] %v369_v19  ;;  %v373_v21 = vld [vmem:[%s1969_s18 + $0x148] sm:$0xff] }
  0x1f   : > { %372 = vst [vmem:[%s1974_s19 + $0xa0] sm:$0xff] %v371_v20  ;;  %v375_v22 = vld [vmem:[%s1969_s18 + $0x160] sm:$0xff]  ;;  %v377_v23 = vld [vmem:[%s1969_s18 + $0x168] sm:$0xff]  ;;  %374 = vst [vmem:[%s1974_s19 + $0xa8] sm:$0xff] %v373_v21 }
  0x20   : > { %376 = vst [vmem:[%s1974_s19 + $0xb0] sm:$0xff] %v375_v22  ;;  %378 = vst [vmem:[%s1974_s19 + $0xb8] sm:$0xff] %v377_v23  ;;  %v379_v24 = vld [vmem:[%s1969_s18 + $0x180] sm:$0xff]  ;;  %v381_v25 = vld [vmem:[%s1969_s18 + $0x188] sm:$0xff] }
  0x21   : > { %v383_v26 = vld [vmem:[%s1969_s18 + $0x1a0] sm:$0xff]  ;;  %380 = vst [vmem:[%s1974_s19 + $0xc0] sm:$0xff] %v379_v24  ;;  %382 = vst [vmem:[%s1974_s19 + $0xc8] sm:$0xff] %v381_v25  ;;  %v385_v27 = vld [vmem:[%s1969_s18 + $0x1a8] sm:$0xff] }
  0x22   : > { %384 = vst [vmem:[%s1974_s19 + $0xd0] sm:$0xff] %v383_v26  ;;  %v387_v28 = vld [vmem:[%s1969_s18 + $0x1c0] sm:$0xff]  ;;  %v389_v29 = vld [vmem:[%s1969_s18 + $0x1c8] sm:$0xff]  ;;  %386 = vst [vmem:[%s1974_s19 + $0xd8] sm:$0xff] %v385_v27 }
  0x23   : > { %388 = vst [vmem:[%s1974_s19 + $0xe0] sm:$0xff] %v387_v28  ;;  %390 = vst [vmem:[%s1974_s19 + $0xe8] sm:$0xff] %v389_v29  ;;  %v391_v30 = vld [vmem:[%s1969_s18 + $0x1e0] sm:$0xff]  ;;  %v393_v31 = vld [vmem:[%s1969_s18 + $0x1e8] sm:$0xff] }
  0x24   : > { %392 = vst [vmem:[%s1974_s19 + $0xf0] sm:$0xff] %v391_v30  ;;  %394 = vst [vmem:[%s1974_s19 + $0xf8] sm:$0xff] %v393_v31 }
  0x25 PF: > { %p1472_p10 = scmp.ge.s32.totalorder %s1872_s27, 1  ;;  %p399_p11 = scmp.lt.s32.totalorder %s1872_s27, 3 }
  0x27   : > { %p400_p12 = pnand %p1472_p10, %p399_p11 }
  0x28   : > { %s2046_s29 = sand.u32 (!%p400_p12), 1, %s1864_s25   ;;  %s1874_s19 = smov (!%p400_p12), [#allocation3]  }
  0x29   : > { %403 = sbr.rel (%p400_p12) target bundleno = 750 (0x2ee), region = 82  ;;  %s1473_s8 = sshll.u32 (!%p400_p12), %s2046_s29, 8 }
  0x2a   : > { %s2052_s14 = scalar_lea.vmem (!%p400_p12), [#allocation2], %s1473_s8  ;;  %s1550_s8 = sshll.u32 (!%p400_p12), %s1465_s28, 4 }
  0x2b   : > { %s435_s9 = scalar_lea.vmem (!%p400_p12), [#allocation3], %s2046_s29  ;;  %s1403_s16 = scalar_lea.hbm (!%p400_p12), %s2329_s7, %s1550_s8 }
  0x2c   : > { %s1405_s13 = sshll.u32 (!%p400_p12), %s435_s9, 4  ;;  %s1393_s17 = scalar_lea.sflag (!%p400_p12), [#allocation4], %s2046_s29  ;;  %s1406_s13 = int_to_ptr.vmem [resolvable:$true] %s1405_s13 }
  0x2d   : > { %s1812_s18 = scalar_lea.vmem (!%p400_p12), %s1406_s13, 16  ;;  %s1816_s20 = sshll.u32 (!%p400_p12), %s1874_s19, 4  ;;  %s1817_s20 = int_to_ptr.vmem [resolvable:$false] %s1816_s20 }
  0x2e   : > { %v470_v32 = vld [vmem:[%s2323_s1 + $0x10] sm:$0x1]  ;;  %vm575_vm0 = vcmask 1040384   ;;  %v469_v33 = vld [vmem:[%s2323_s1 + $0x8] sm:$0xff]  ;;  %vm478_vm1 = vcmask 138240   ;;  %v468_v34 = vld [vmem:[%s2323_s1] sm:$0xff]  ;;  %p1813_p13 = scmp.ne.s32.totalorder %s1406_s13, %s1812_s18  ;;  %p1819_p2 = scmp.lt.s32.totalorder %s1406_s13, %s1817_s20 }
  0x2f   : > { %1637 = vmatprep.subr.msk.mxu0 %vm575_vm0, %v470_v32  ;;  %1767 = vmatprep.subr.msk.mxu1 %vm575_vm0, %v470_v32  ;;  %v436_v35 = vld [vmem:[%s2052_s14] sm:$0xff]  ;;  %v437_v36 = vld [vmem:[%s2052_s14 + $0x8] sm:$0xff]  ;;  %v438_v37 = vld [vmem:[%s2052_s14 + $0x10] sm:$0xff]  ;;  %vm847_vm2 = vcmask 261120   ;;  %vm1379_vm3 = vcmask 523264   ;;  %vm1390_vm4 = vcmask 516096  }
  0x30   : > { %1638 = vmatpush3.msk.msra.mxu0 %vm575_vm0, %v470_v32  ;;  %1770 = vmatpush3.msk.msra.mxu1 %vm575_vm0, %v470_v32  ;;  %v839_v38 = vld [vmem:[%s2325_s3 + $0x18] sm:$0xff]  ;;  %v440_v40 = vld [vmem:[%s2052_s14 + $0x20] sm:$0xff]  ;;  %v441_v41 = vld [vmem:[%s2052_s14 + $0x28] sm:$0xff]  ;;  %p1814_p0 = pnand %p1813_p13, %p1953_p6  ;;  %s1818_s28 = scalar_lea.vmem %s1817_s20, 32 }
  0x31   : > { %1639 = vmatprep.subr.mxu0 %v469_v33  ;;  %1768 = vmatprep.subr.mxu1 %v469_v33  ;;  %v439_v39 = vld [vmem:[%s2052_s14 + $0x18] sm:$0xff]  ;;  %v464_v42 = vld [vmem:[%s2052_s14 + $0xe0] sm:$0xff]  ;;  %v465_v43 = vld [vmem:[%s2052_s14 + $0xe8] sm:$0xff]  ;;  %p1820_p3 = scmp.lt.s32.totalorder %s1818_s28, %s1812_s18 }
  0x32   : > { %1640 = vmatpush3.msra.mxu0 %v469_v33  ;;  %1643 = vmatprep.mubr.msk.f32.mxu0 %vm478_vm1, %v436_v35  ;;  %v442_v44 = vld [vmem:[%s2052_s14 + $0x30] sm:$0xff]  ;;  %v467_v46 = vld [vmem:[%s2052_s14 + $0xf8] sm:$0xff]  ;;  %v444_v48 = vld [vmem:[%s2052_s14 + $0x40] sm:$0xff]  ;;  %p1815_p1 = pneg %p1814_p0 }
  0x33   : > { %1641 = vmatprep.subr.mxu0 %v468_v34  ;;  %1771 = vmatpush3.msra.mxu1 %v469_v33  ;;  %v466_v45 = vld [vmem:[%s2052_s14 + $0xf0] sm:$0xff]  ;;  %v443_v47 = vld [vmem:[%s2052_s14 + $0x38] sm:$0xff]  ;;  %v445_v49 = vld [vmem:[%s2052_s14 + $0x48] sm:$0xff]  ;;  %p1821_p4 = por %p1820_p3, %p1819_p2 }
  0x34   : > { %1642 = vmatpush3.msra.mxu0 %v468_v34  ;;  %1769 = vmatprep.subr.mxu1 %v468_v34  ;;  %v446_v50 = vld [vmem:[%s2052_s14 + $0x50] sm:$0xff]  ;;  %v447_v51 = vld [vmem:[%s2052_s14 + $0x58] sm:$0xff]  ;;  %v448_v52 = vld [vmem:[%s2052_s14 + $0x60] sm:$0xff] }
  0x35   : > { %1644 = vmatmul.mubr.msk.f32.vlgmr.msra.gmra.mxu0 %vm478_vm1, %v437_v36  ;;  %1772 = vmatpush3.msra.mxu1 %v468_v34  ;;  %v449_v53 = vld [vmem:[%s2052_s14 + $0x68] sm:$0xff]  ;;  %v450_v54 = vld [vmem:[%s2052_s14 + $0x70] sm:$0xff]  ;;  %v451_v55 = vld [vmem:[%s2052_s14 + $0x78] sm:$0xff]  ;;  %p1822_p5 = pnand %p1821_p4, %p1815_p1 }
  0x36   : > { %1646 = vmatprep.mubr.msk.f32.mxu0 %vm478_vm1, %v438_v37  ;;  %1691 = vmatprep.subr.mxu1 %v839_v38  ;;  %v452_v56 = vld [vmem:[%s2052_s14 + $0x80] sm:$0xff]  ;;  %v453_v57 = vld [vmem:[%s2052_s14 + $0x88] sm:$0xff]  ;;  %v454_v58 = vld [vmem:[%s2052_s14 + $0x90] sm:$0xff] }
  0x37   : > { %1685 = vmatprep.mubr.msk.f32.mxu1 %vm478_vm1, %v464_v42  ;;  %v455_v59 = vld [vmem:[%s2052_s14 + $0x98] sm:$0xff]  ;;  %v456_v60 = vld [vmem:[%s2052_s14 + $0xa0] sm:$0xff]  ;;  %v457_v61 = vld [vmem:[%s2052_s14 + $0xa8] sm:$0xff] }
  0x38   : > { %1686 = vmatmul.mubr.msk.f32.vlgmr.msra.gmra.mxu1 %vm478_vm1, %v465_v43  ;;  %v458_v62 = vld [vmem:[%s2052_s14 + $0xb0] sm:$0xff]  ;;  %v459_v63 = vld [vmem:[%s2052_s14 + $0xb8] sm:$0xff]  ;;  %v460_v0 = vld [vmem:[%s2052_s14 + $0xc0] sm:$0xff] }
  0x39   : > { %1647 = vmatmul.mubr.msk.f32.gmra.mxu0 %vm478_vm1, %v439_v39  ;;  %1688 = vmatprep.mubr.msk.f32.mxu1 %vm478_vm1, %v466_v45  ;;  %v461_v1 = vld [vmem:[%s2052_s14 + $0xc8] sm:$0xff]  ;;  %v462_v2 = vld [vmem:[%s2052_s14 + $0xd0] sm:$0xff]  ;;  %v463_v3 = vld [vmem:[%s2052_s14 + $0xd8] sm:$0xff] }
  0x3a   : > { %1649 = vmatprep.mubr.msk.f32.mxu0 %vm478_vm1, %v440_v40  ;;  %1692 = vmatpush3.msra.mxu1 %v839_v38  ;;  %v838_v4 = vld [vmem:[%s2325_s3 + $0x10] sm:$0xff]  ;;  %v837_v5 = vld [vmem:[%s2325_s3 + $0x8] sm:$0xff]  ;;  %v836_v6 = vld [vmem:[%s2325_s3] sm:$0xff] }
  0x3b   : > { %1693 = vmatprep.subr.mxu1 %v838_v4  ;;  %v2133_v7 = vld [vmem:[%s2324_s2] ss:$0 sm:$0xff] }
  0x3c   : > { %1689 = vmatmul.mubr.msk.f32.gmra.mxu1 %vm478_vm1, %v467_v46 }
  0x3d   : > { %1650 = vmatmul.mubr.msk.f32.gmra.mxu0 %vm478_vm1, %v441_v41  ;;  %1694 = vmatpush3.msra.mxu1 %v838_v4 }
  0x3e   : > { %1652 = vmatprep.mubr.msk.f32.mxu0 %vm478_vm1, %v442_v44  ;;  %1695 = vmatprep.subr.mxu1 %v837_v5 }
  0x3f   : > { %1696 = vmatpush3.msra.mxu1 %v837_v5 }
  0x40   : > { %1697 = vmatprep.subr.mxu1 %v836_v6 }
  0x41   : > { %1653 = vmatmul.mubr.msk.f32.gmra.mxu0 %vm478_vm1, %v443_v47  ;;  %1698 = vmatpush3.msra.mxu1 %v836_v6 }
  0x42   : > { %1655 = vmatprep.mubr.msk.f32.mxu0 %vm478_vm1, %v444_v48 }
  0x45   : > { %1656 = vmatmul.mubr.msk.f32.gmra.mxu0 %vm478_vm1, %v445_v49 }
  0x46   : > { %1658 = vmatprep.mubr.msk.f32.mxu0 %vm478_vm1, %v446_v50 }
  0x49   : > { %1659 = vmatmul.mubr.msk.f32.gmra.mxu0 %vm478_vm1, %v447_v51 }
  0x4a   : > { %1661 = vmatprep.mubr.msk.f32.mxu0 %vm478_vm1, %v448_v52 }
  0x4d   : > { %1662 = vmatmul.mubr.msk.f32.gmra.mxu0 %vm478_vm1, %v449_v53 }
  0x4e   : > { %1664 = vmatprep.mubr.msk.f32.mxu0 %vm478_vm1, %v450_v54 }
  0x51   : > { %1665 = vmatmul.mubr.msk.f32.gmra.mxu0 %vm478_vm1, %v451_v55 }
  0x52   : > { %1667 = vmatprep.mubr.msk.f32.mxu0 %vm478_vm1, %v452_v56 }
  0x55   : > { %1668 = vmatmul.mubr.msk.f32.gmra.mxu0 %vm478_vm1, %v453_v57 }
  0x56   : > { %1670 = vmatprep.mubr.msk.f32.mxu0 %vm478_vm1, %v454_v58 }
  0x59   : > { %1671 = vmatmul.mubr.msk.f32.gmra.mxu0 %vm478_vm1, %v455_v59 }
  0x5a   : > { %1673 = vmatprep.mubr.msk.f32.mxu0 %vm478_vm1, %v456_v60 }
  0x5d   : > { %1674 = vmatmul.mubr.msk.f32.gmra.mxu0 %vm478_vm1, %v457_v61 }
  0x5e   : > { %1676 = vmatprep.mubr.msk.f32.mxu0 %vm478_vm1, %v458_v62 }
  0x61   : > { %1677 = vmatmul.mubr.msk.f32.gmra.mxu0 %vm478_vm1, %v459_v63 }
  0x62   : > { %1679 = vmatprep.mubr.msk.f32.mxu0 %vm478_vm1, %v460_v0 }
  0x65   : > { %1680 = vmatmul.mubr.msk.f32.gmra.mxu0 %vm478_vm1, %v461_v1 }
  0x66   : > { %1682 = vmatprep.mubr.msk.f32.mxu0 %vm478_vm1, %v462_v2 }
  0x69   : > { %1683 = vmatmul.mubr.msk.f32.gmra.mxu0 %vm478_vm1, %v463_v3 }
  0xf5   : > { %v1645_v8 = vpop.f32.mrf.mxu0 }
  0xf6   : > { %v651_v9 = vadd.f32 %v1645_v8, %v2133_v7 }
  0xf7   : > { %v645_v10 = vpop.f32.mrf.mxu0 }
  0xf8   : > { %v646_v11 = vadd.f32 %v2133_v7, %v645_v10  ;;  %v805_v14 = vmax.f32 %v651_v9, 0.0  ;;  %v1687_v8 = vpop.f32.mrf.mxu1 }
  0xf9   : > { %v1648_v12 = vpop.f32.mrf.mxu0 }
  0xfa   : > { %v804_v13 = vmax.f32 %v646_v11, 0.0  ;;  %v661_v15 = vadd.f32 %v1648_v12, %v2133_v7 }
  0xfb   : > { %v655_v16 = vpop.f32.mrf.mxu0 }
  0xfc   : > { %v656_v17 = vadd.f32 %v2133_v7, %v655_v16  ;;  %1699 = vmatprep.mubr.msk.f32.mxu1 %vm847_vm2, %v804_v13  ;;  %v807_v20 = vmax.f32 %v661_v15, 0.0  ;;  %v785_v15 = vpop.f32.mrf.mxu1 }
  0xfd   : > { %v1651_v18 = vpop.f32.mrf.mxu0  ;;  %1700 = vmatmul.mubr.msk.f32.vlgmr.msra.gmra.mxu1 %vm847_vm2, %v805_v14 }
  0xfe   : > { %v806_v19 = vmax.f32 %v656_v17, 0.0  ;;  %v671_v21 = vadd.f32 %v1651_v18, %v2133_v7 }
  0xff   : > { %v665_v22 = vpop.f32.mrf.mxu0 }
 0x100   : > { %v666_v23 = vadd.f32 %v2133_v7, %v665_v22  ;;  %1702 = vmatprep.mubr.msk.f32.mxu1 %vm847_vm2, %v806_v19  ;;  %v809_v26 = vmax.f32 %v671_v21, 0.0  ;;  %v1690_v22 = vpop.f32.mrf.mxu1 }
 0x101   : > { %v1654_v24 = vpop.f32.mrf.mxu0  ;;  %1703 = vmatmul.mubr.msk.f32.gmra.mxu1 %vm847_vm2, %v807_v20 }
 0x102   : > { %v808_v25 = vmax.f32 %v666_v23, 0.0  ;;  %v681_v27 = vadd.f32 %v1654_v24, %v2133_v7 }
 0x103   : > { %v675_v28 = vpop.f32.mrf.mxu0 }
 0x104   : > { %v676_v29 = vadd.f32 %v2133_v7, %v675_v28  ;;  %1705 = vmatprep.mubr.msk.f32.mxu1 %vm847_vm2, %v808_v25  ;;  %v811_v32 = vmax.f32 %v681_v27, 0.0 }
 0x105   : > { %v1657_v30 = vpop.f32.mrf.mxu0  ;;  %1706 = vmatmul.mubr.msk.f32.gmra.mxu1 %vm847_vm2, %v809_v26  ;;  %v786_v26 = vadd.f32 %v2133_v7, %v785_v15 }
 0x106   : > { %v810_v31 = vmax.f32 %v676_v29, 0.0  ;;  %v691_v33 = vadd.f32 %v1657_v30, %v2133_v7  ;;  %v795_v30 = vpop.f32.mrf.mxu1 }
 0x107   : > { %v685_v34 = vpop.f32.mrf.mxu0 }
 0x108   : > { %v686_v35 = vadd.f32 %v2133_v7, %v685_v34  ;;  %1708 = vmatprep.mubr.msk.f32.mxu1 %vm847_vm2, %v810_v31  ;;  %v813_v38 = vmax.f32 %v691_v33, 0.0  ;;  %v832_v33 = vmax.f32 %v786_v26, 0.0  ;;  %v796_v34 = vadd.f32 %v2133_v7, %v795_v30 }
 0x109   : > { %v1660_v36 = vpop.f32.mrf.mxu0  ;;  %1709 = vmatmul.mubr.msk.f32.gmra.mxu1 %vm847_vm2, %v811_v32 }
 0x10a   : > { %v812_v37 = vmax.f32 %v686_v35, 0.0  ;;  %v701_v39 = vadd.f32 %v1660_v36, %v2133_v7  ;;  %v791_v36 = vadd.f32 %v1687_v8, %v2133_v7 }
 0x10b   : > { %v695_v40 = vpop.f32.mrf.mxu0 }
 0x10c   : > { %v696_v41 = vadd.f32 %v2133_v7, %v695_v40  ;;  %1711 = vmatprep.mubr.msk.f32.mxu1 %vm847_vm2, %v812_v37  ;;  %v815_v44 = vmax.f32 %v701_v39, 0.0  ;;  %v834_v37 = vmax.f32 %v796_v34, 0.0  ;;  %v801_v39 = vadd.f32 %v1690_v22, %v2133_v7 }
 0x10d   : > { %v1663_v42 = vpop.f32.mrf.mxu0  ;;  %1712 = vmatmul.mubr.msk.f32.gmra.mxu1 %vm847_vm2, %v813_v38  ;;  %v833_v38 = vmax.f32 %v791_v36, 0.0 }
 0x10e   : > { %v814_v43 = vmax.f32 %v696_v41, 0.0  ;;  %v711_v45 = vadd.f32 %v1663_v42, %v2133_v7  ;;  %v835_v40 = vmax.f32 %v801_v39, 0.0  ;;  %v1228_v41 = vld [vmem:[%s2327_s5 + $0x18] sm:$0xff]  ;;  %v1227_v42 = vld [vmem:[%s2327_s5 + $0x10] sm:$0xff] }
 0x10f   : > { %v705_v46 = vpop.f32.mrf.mxu0  ;;  %1747 = vmatprep.subr.mxu0 %v1228_v41 }
 0x110   : > { %v706_v47 = vadd.f32 %v2133_v7, %v705_v46  ;;  %1714 = vmatprep.mubr.msk.f32.mxu1 %vm847_vm2, %v814_v43  ;;  %v817_v50 = vmax.f32 %v711_v45, 0.0  ;;  %1748 = vmatpush3.msra.mxu0 %v1228_v41  ;;  %v1225_v43 = vld [vmem:[%s2327_s5] sm:$0xff] }
 0x111   : > { %v1666_v48 = vpop.f32.mrf.mxu0  ;;  %1715 = vmatmul.mubr.msk.f32.gmra.mxu1 %vm847_vm2, %v815_v44  ;;  %1749 = vmatprep.subr.mxu0 %v1227_v42 }
 0x112   : > { %v816_v49 = vmax.f32 %v706_v47, 0.0  ;;  %v721_v51 = vadd.f32 %v1666_v48, %v2133_v7  ;;  %1750 = vmatpush3.msra.mxu0 %v1227_v42 }
 0x113   : > { %v715_v52 = vpop.f32.mrf.mxu0 }
 0x114   : > { %v716_v53 = vadd.f32 %v2133_v7, %v715_v52  ;;  %1717 = vmatprep.mubr.msk.f32.mxu1 %vm847_vm2, %v816_v49  ;;  %v819_v56 = vmax.f32 %v721_v51, 0.0 }
 0x115   : > { %v1669_v54 = vpop.f32.mrf.mxu0  ;;  %1718 = vmatmul.mubr.msk.f32.gmra.mxu1 %vm847_vm2, %v817_v50 }
 0x116   : > { %v818_v55 = vmax.f32 %v716_v53, 0.0  ;;  %v731_v57 = vadd.f32 %v1669_v54, %v2133_v7 }
 0x117   : > { %v725_v58 = vpop.f32.mrf.mxu0 }
 0x118   : > { %v726_v59 = vadd.f32 %v2133_v7, %v725_v58  ;;  %1720 = vmatprep.mubr.msk.f32.mxu1 %vm847_vm2, %v818_v55  ;;  %v821_v62 = vmax.f32 %v731_v57, 0.0 }
 0x119   : > { %v1672_v60 = vpop.f32.mrf.mxu0  ;;  %1721 = vmatmul.mubr.msk.f32.gmra.mxu1 %vm847_vm2, %v819_v56 }
 0x11a   : > { %v820_v61 = vmax.f32 %v726_v59, 0.0  ;;  %v741_v63 = vadd.f32 %v1672_v60, %v2133_v7 }
 0x11b   : > { %v735_v0 = vpop.f32.mrf.mxu0 }
 0x11c   : > { %v736_v1 = vadd.f32 %v2133_v7, %v735_v0  ;;  %1723 = vmatprep.mubr.msk.f32.mxu1 %vm847_vm2, %v820_v61  ;;  %v823_v4 = vmax.f32 %v741_v63, 0.0 }
 0x11d   : > { %v1675_v2 = vpop.f32.mrf.mxu0  ;;  %1724 = vmatmul.mubr.msk.f32.gmra.mxu1 %vm847_vm2, %v821_v62 }
 0x11e   : > { %v822_v3 = vmax.f32 %v736_v1, 0.0  ;;  %v751_v5 = vadd.f32 %v1675_v2, %v2133_v7  ;;  %v2220_v1 = vld [vmem:[%s2326_s4] ss:$0 sm:$0xff] }
 0x11f   : > { %v745_v6 = vpop.f32.mrf.mxu0 }
 0x120   : > { %v746_v9 = vadd.f32 %v2133_v7, %v745_v6  ;;  %1726 = vmatprep.mubr.msk.f32.mxu1 %vm847_vm2, %v822_v3  ;;  %v825_v12 = vmax.f32 %v751_v5, 0.0 }
 0x121   : > { %v1678_v10 = vpop.f32.mrf.mxu0  ;;  %1727 = vmatmul.mubr.msk.f32.gmra.mxu1 %vm847_vm2, %v823_v4 }
 0x122   : > { %v824_v11 = vmax.f32 %v746_v9, 0.0  ;;  %v761_v13 = vadd.f32 %v1678_v10, %v2133_v7 }
 0x123   : > { %v755_v14 = vpop.f32.mrf.mxu0 }
 0x124   : > { %v756_v16 = vadd.f32 %v2133_v7, %v755_v14  ;;  %1729 = vmatprep.mubr.msk.f32.mxu1 %vm847_vm2, %v824_v11  ;;  %v827_v19 = vmax.f32 %v761_v13, 0.0 }
 0x125   : > { %v1681_v17 = vpop.f32.mrf.mxu0  ;;  %1730 = vmatmul.mubr.msk.f32.gmra.mxu1 %vm847_vm2, %v825_v12 }
 0x126   : > { %v826_v18 = vmax.f32 %v756_v16, 0.0  ;;  %v771_v20 = vadd.f32 %v1681_v17, %v2133_v7 }
 0x127   : > { %v765_v21 = vpop.f32.mrf.mxu0 }
 0x128   : > { %v766_v23 = vadd.f32 %v2133_v7, %v765_v21  ;;  %1732 = vmatprep.mubr.msk.f32.mxu1 %vm847_vm2, %v826_v18  ;;  %v829_v27 = vmax.f32 %v771_v20, 0.0 }
 0x129   : > { %v1684_v24 = vpop.f32.mrf.mxu0  ;;  %1733 = vmatmul.mubr.msk.f32.gmra.mxu1 %vm847_vm2, %v827_v19 }
 0x12a   : > { %v828_v25 = vmax.f32 %v766_v23, 0.0  ;;  %v781_v28 = vadd.f32 %v1684_v24, %v2133_v7 }
 0x12b   : > { %v775_v29 = vpop.f32.mrf.mxu0 }
 0x12c   : > { %v776_v31 = vadd.f32 %v2133_v7, %v775_v29  ;;  %1735 = vmatprep.mubr.msk.f32.mxu1 %vm847_vm2, %v828_v25  ;;  %v831_v35 = vmax.f32 %v781_v28, 0.0  ;;  %v1226_v7 = vld [vmem:[%s2327_s5 + $0x8] sm:$0xff] }
 0x12d   : > { %1736 = vmatmul.mubr.msk.f32.gmra.mxu1 %vm847_vm2, %v829_v27  ;;  %1751 = vmatprep.subr.mxu0 %v1226_v7 }
 0x12e   : > { %v830_v32 = vmax.f32 %v776_v31, 0.0  ;;  %1752 = vmatpush3.msra.mxu0 %v1226_v7 }
 0x12f   : > { %1753 = vmatprep.subr.mxu0 %v1225_v43 }
 0x130   : > { %1738 = vmatprep.mubr.msk.f32.mxu1 %vm847_vm2, %v830_v32  ;;  %1754 = vmatpush3.msra.mxu0 %v1225_v43 }
 0x131   : > { %1739 = vmatmul.mubr.msk.f32.gmra.mxu1 %vm847_vm2, %v831_v35 }
 0x132   : > { %1741 = vmatprep.mubr.msk.f32.mxu1 %vm847_vm2, %v832_v33 }
 0x135   : > { %1742 = vmatmul.mubr.msk.f32.gmra.mxu1 %vm847_vm2, %v833_v38 }
 0x136   : > { %1744 = vmatprep.mubr.msk.f32.mxu1 %vm847_vm2, %v834_v37 }
 0x139   : > { %1745 = vmatmul.mubr.msk.f32.gmra.mxu1 %vm847_vm2, %v835_v40 }
 0x1bd   : > { %v1701_v44 = vpop.f32.mrf.mxu1 }
 0x1be   : > { %v1016_v3 = vadd.f32 %v1701_v44, %v2220_v1 }
 0x1bf   : > { %v1010_v45 = vpop.f32.mrf.mxu1 }
 0x1c0   : > { %v1011_v6 = vadd.f32 %v2220_v1, %v1010_v45  ;;  %v1170_v15 = vmax.f32 %v1016_v3, 0.0 }
 0x1c1   : > { %v1704_v46 = vpop.f32.mrf.mxu1 }
 0x1c2   : > { %v1026_v8 = vadd.f32 %v1704_v46, %v2220_v1  ;;  %v1169_v20 = vmax.f32 %v1011_v6, 0.0 }
 0x1c3   : > { %v1020_v47 = vpop.f32.mrf.mxu1 }
 0x1c4   : > { %v1021_v9 = vadd.f32 %v2220_v1, %v1020_v47  ;;  %v1172_v21 = vmax.f32 %v1026_v8, 0.0 }
 0x1c5   : > { %v1707_v48 = vpop.f32.mrf.mxu1 }
 0x1c6   : > { %v2230_v10 = vadd.f32 %v1707_v48, %v2220_v1  ;;  %v1171_v24 = vmax.f32 %v1021_v9, 0.0 }
 0x1c7   : > { %v1030_v49 = vpop.f32.mrf.mxu1 }
 0x1c8   : > { %v2233_v11 = vadd.f32 %v2220_v1, %v1030_v49  ;;  %v1174_v25 = vmax.f32 %v2230_v10, 0.0 }
 0x1c9   : > { %v2211_v50 = vpop.f32.mrf.mxu1 }
 0x1ca   : > { %v1173_v26 = vmax.f32 %v2233_v11, 0.0 }
 0x1cb   : > { %v1040_v51 = vpop.f32.mrf.mxu1 }
 0x1cc   : > { %v2246_v29 = vadd.f32 %v2220_v1, %v1040_v51 }
 0x1cd   : > { %v1713_v52 = vpop.f32.mrf.mxu1 }
 0x1ce   : > { %v1056_v4 = vadd.f32 %v1713_v52, %v2220_v1 }
 0x1cf   : > { %v1050_v53 = vpop.f32.mrf.mxu1 }
 0x1d0   : > { %v1051_v12 = vadd.f32 %v2220_v1, %v1050_v53  ;;  %v1178_v16 = vmax.f32 %v1056_v4, 0.0 }
 0x1d1   : > { %v1716_v54 = vpop.f32.mrf.mxu1 }
 0x1d2   : > { %v1066_v14 = vadd.f32 %v1716_v54, %v2220_v1  ;;  %v1177_v27 = vmax.f32 %v1051_v12, 0.0  ;;  %v1202_v33 = vmax.f32 %v1170_v15, %v1178_v16 }
 0x1d3   : > { %v1060_v55 = vpop.f32.mrf.mxu1 }
 0x1d4   : > { %v1061_v17 = vadd.f32 %v2220_v1, %v1060_v55  ;;  %v1180_v30 = vmax.f32 %v1066_v14, 0.0  ;;  %v1201_v42 = vmax.f32 %v1169_v20, %v1177_v27  ;;  %v1046_v20 = vadd.f32 %v2211_v50, %v2220_v1 }
 0x1d5   : > { %v1719_v56 = vpop.f32.mrf.mxu1  ;;  %v1175_v50 = vmax.f32 %v2246_v29, 0.0 }
 0x1d6   : > { %v1179_v34 = vmax.f32 %v1061_v17, 0.0  ;;  %v1076_v7 = vadd.f32 %v1719_v56, %v2220_v1  ;;  %v1204_v46 = vmax.f32 %v1172_v21, %v1180_v30 }
 0x1d7   : > { %v1070_v57 = vpop.f32.mrf.mxu1 }
 0x1d8   : > { %v1071_v43 = vadd.f32 %v2220_v1, %v1070_v57  ;;  %v1203_v51 = vmax.f32 %v1171_v24, %v1179_v34  ;;  %v1182_v57 = vmax.f32 %v1076_v7, 0.0  ;;  %v1176_v34 = vmax.f32 %v1046_v20, 0.0 }
 0x1d9   : > { %v2213_v58 = vpop.f32.mrf.mxu1 }
 0x1db   : > { %v2215_v59 = vpop.f32.mrf.mxu1 }
 0x1dc   : > { %v1081_v8 = vadd.f32 %v2220_v1, %v2215_v59 }
 0x1dd   : > { %v1725_v60 = vpop.f32.mrf.mxu1 }
 0x1de   : > { %v1096_v18 = vadd.f32 %v1725_v60, %v2220_v1  ;;  %v1183_v24 = vmax.f32 %v1081_v8, 0.0 }
 0x1df   : > { %v1090_v61 = vpop.f32.mrf.mxu1 }
 0x1e0   : > { %v1091_v22 = vadd.f32 %v2220_v1, %v1090_v61  ;;  %v1186_v35 = vmax.f32 %v1096_v18, 0.0 }
 0x1e1   : > { %v1728_v62 = vpop.f32.mrf.mxu1 }
 0x1e2   : > { %v1106_v36 = vadd.f32 %v1728_v62, %v2220_v1  ;;  %v1185_v38 = vmax.f32 %v1091_v22, 0.0 }
 0x1e3   : > { %v1100_v63 = vpop.f32.mrf.mxu1 }
 0x1e4   : > { %v1101_v39 = vadd.f32 %v2220_v1, %v1100_v63  ;;  %v1188_v52 = vmax.f32 %v1106_v36, 0.0  ;;  %v1181_v63 = vmax.f32 %v1071_v43, 0.0 }
 0x1e5   : > { %v1731_v0 = vpop.f32.mrf.mxu1 }
 0x1e6   : > { %v1116_v53 = vadd.f32 %v1731_v0, %v2220_v1  ;;  %v1187_v60 = vmax.f32 %v1101_v39, 0.0  ;;  %v1205_v21 = vmax.f32 %v1173_v26, %v1181_v63 }
 0x1e7   : > { %v1110_v2 = vpop.f32.mrf.mxu1 }
 0x1e8   : > { %v1111_v54 = vadd.f32 %v2220_v1, %v1110_v2  ;;  %v1086_v2 = vadd.f32 %v2213_v58, %v2220_v1  ;;  %v1190_v12 = vmax.f32 %v1116_v53, 0.0 }
 0x1e9   : > { %v2224_v5 = vpop.f32.mrf.mxu1 }
 0x1ea   : > { %v1189_v14 = vmax.f32 %v1111_v54, 0.0  ;;  %v1126_v15 = vadd.f32 %v2224_v5, %v2220_v1  ;;  %v1184_v30 = vmax.f32 %v1086_v2, 0.0 }
 0x1eb   : > { %v2236_v13 = vpop.f32.mrf.mxu1 }
 0x1ec   : > { %v1121_v59 = vadd.f32 %v2220_v1, %v2236_v13  ;;  %v1206_v13 = vmax.f32 %v1174_v25, %v1182_v57 }
 0x1ed   : > { %v1737_v19 = vpop.f32.mrf.mxu1 }
 0x1ee   : > { %v1136_v23 = vadd.f32 %v1737_v19, %v2220_v1  ;;  %v1191_v26 = vmax.f32 %v1121_v59, 0.0 }
 0x1ef   : > { %v1130_v28 = vpop.f32.mrf.mxu1 }
 0x1f0   : > { %v1194_v31 = vmax.f32 %v1136_v23, 0.0  ;;  %v1131_v32 = vadd.f32 %v2220_v1, %v1130_v28 }
 0x1f1   : > { %v1740_v37 = vpop.f32.mrf.mxu1 }
 0x1f2   : > { %v1193_v40 = vmax.f32 %v1131_v32, 0.0  ;;  %v1146_v41 = vadd.f32 %v1740_v37, %v2220_v1  ;;  %v1210_v44 = vmax.f32 %v1186_v35, %v1194_v31  ;;  %v1192_v31 = vmax.f32 %v1126_v15, 0.0 }
 0x1f3   : > { %v1140_v45 = vpop.f32.mrf.mxu1  ;;  %v1207_v37 = vmax.f32 %v1175_v50, %v1183_v24 }
 0x1f4   : > { %v1209_v47 = vmax.f32 %v1185_v38, %v1193_v40  ;;  %v1196_v48 = vmax.f32 %v1146_v41, 0.0  ;;  %v1141_v49 = vadd.f32 %v2220_v1, %v1140_v45  ;;  %v1218_v3 = vmax.f32 %v1202_v33, %v1210_v44 }
 0x1f5   : > { %v1743_v55 = vpop.f32.mrf.mxu1 }
 0x1f6   : > { %v1217_v61 = vmax.f32 %v1201_v42, %v1209_v47  ;;  %v1195_v62 = vmax.f32 %v1141_v49, 0.0  ;;  %v1156_v56 = vadd.f32 %v1743_v55, %v2220_v1  ;;  %v1212_v4 = vmax.f32 %v1188_v52, %v1196_v48  ;;  %v1541_v42 = vld [vmem:[%s2328_s6] ss:$0 sm:$0xff] }
 0x1f7   : > { %v1150_v6 = vpop.f32.mrf.mxu1 }
 0x1f8   : > { %v1211_v9 = vmax.f32 %v1187_v60, %v1195_v62  ;;  %v1198_v11 = vmax.f32 %v1156_v56, 0.0  ;;  %v1151_v0 = vadd.f32 %v2220_v1, %v1150_v6  ;;  %1755 = vmatprep.mubr.msk.f32.mxu0 %vm847_vm2, %v1217_v61  ;;  %v1220_v58 = vmax.f32 %v1204_v46, %v1212_v4 }
 0x1f9   : > { %v1746_v16 = vpop.f32.mrf.mxu1  ;;  %1756 = vmatmul.mubr.msk.f32.vlgmr.msra.gmra.mxu0 %vm847_vm2, %v1218_v3 }
 0x1fa   : > { %v1219_v17 = vmax.f32 %v1203_v51, %v1211_v9  ;;  %v1197_v18 = vmax.f32 %v1151_v0, 0.0  ;;  %v1166_v19 = vadd.f32 %v1746_v16, %v2220_v1  ;;  %v1214_v22 = vmax.f32 %v1190_v12, %v1198_v11 }
 0x1fb   : > { %v1160_v23 = vpop.f32.mrf.mxu1 }
 0x1fc   : > { %v1213_v27 = vmax.f32 %v1189_v14, %v1197_v18  ;;  %v1200_v5 = vmax.f32 %v1166_v19, 0.0  ;;  %v1161_v28 = vadd.f32 %v2220_v1, %v1160_v23  ;;  %1758 = vmatprep.mubr.msk.f32.mxu0 %vm847_vm2, %v1219_v17  ;;  %v1222_v35 = vmax.f32 %v1206_v13, %v1214_v22 }
 0x1fd   : > { %1759 = vmatmul.mubr.msk.f32.gmra.mxu0 %vm847_vm2, %v1220_v58  ;;  %v1208_v1 = vmax.f32 %v1176_v34, %v1184_v30 }
 0x1fe   : > { %v1221_v32 = vmax.f32 %v1205_v21, %v1213_v27  ;;  %v1199_v33 = vmax.f32 %v1161_v28, 0.0  ;;  %v1216_v36 = vmax.f32 %v1192_v31, %v1200_v5 }
 0x200   : > { %v1215_v38 = vmax.f32 %v1191_v26, %v1199_v33  ;;  %1761 = vmatprep.mubr.msk.f32.mxu0 %vm847_vm2, %v1221_v32  ;;  %v1224_v25 = vmax.f32 %v1208_v1, %v1216_v36 }
 0x201   : > { %1762 = vmatmul.mubr.msk.f32.gmra.mxu0 %vm847_vm2, %v1222_v35 }
 0x202   : > { %v1223_v10 = vmax.f32 %v1207_v37, %v1215_v38 }
 0x204   : > { %1764 = vmatprep.mubr.msk.f32.mxu0 %vm847_vm2, %v1223_v10 }
 0x205   : > { %1765 = vmatmul.mubr.msk.f32.gmra.mxu0 %vm847_vm2, %v1224_v25 }
 0x2b9   : > { %v1757_v29 = vpop.f32.mrf.mxu0 }
 0x2ba   : > { %v1332_v44 = vadd.f32 %v1757_v29, %v1541_v42 }
 0x2bb   : > { %v1326_v39 = vpop.f32.mrf.mxu0 }
 0x2bc   : > { %v1327_v48 = vadd.f32 %v1541_v42, %v1326_v39  ;;  %v1366_v54 = vmax.f32 %v1332_v44, 0.0 }
 0x2bd   : > { %v1760_v40 = vpop.f32.mrf.mxu0 }
 0x2be   : > { %v1342_v43 = vadd.f32 %v1760_v40, %v1541_v42  ;;  %v1365_v57 = vmax.f32 %v1327_v48, 0.0 }
 0x2bf   : > { %v1336_v41 = vpop.f32.mrf.mxu0 }
 0x2c0   : > { %v1337_v46 = vadd.f32 %v1541_v42, %v1336_v41  ;;  %v1368_v51 = vmax.f32 %v1342_v43, 0.0 }
 0x2c1   : > { %v1763_v7 = vpop.f32.mrf.mxu0 }
 0x2c2   : > { %v1352_v47 = vadd.f32 %v1763_v7, %v1541_v42  ;;  %v1367_v60 = vmax.f32 %v1337_v46, 0.0  ;;  %v1374_v63 = vmax.f32 %v1366_v54, %v1368_v51 }
 0x2c3   : > { %v1346_v45 = vpop.f32.mrf.mxu0 }
 0x2c4   : > { %v1347_v52 = vadd.f32 %v1541_v42, %v1346_v45  ;;  %v1370_v61 = vmax.f32 %v1352_v47, 0.0  ;;  %v1373_v8 = vmax.f32 %v1365_v57, %v1367_v60 }
 0x2c5   : > { %v1766_v49 = vpop.f32.mrf.mxu0 }
 0x2c6   : > { %v1362_v53 = vadd.f32 %v1766_v49, %v1541_v42  ;;  %v1369_v3 = vmax.f32 %v1347_v52, 0.0 }
 0x2c7   : > { %v1356_v55 = vpop.f32.mrf.mxu0 }
 0x2c8   : > { %v1372_v62 = vmax.f32 %v1362_v53, 0.0  ;;  %v1357_v56 = vadd.f32 %v1541_v42, %v1356_v55 }
 0x2ca   : > { %v1376_v4 = vmax.f32 %v1370_v61, %v1372_v62  ;;  %v1371_v6 = vmax.f32 %v1357_v56, 0.0 }
 0x2cc   : > { %v1378_v9 = vmax.f32 %v1374_v63, %v1376_v4  ;;  %v1375_v11 = vmax.f32 %v1369_v3, %v1371_v6 }
 0x2ce   : > { %v1377_v0 = vmax.f32 %v1373_v8, %v1375_v11  ;;  %v1381_v2 = vsel %vm1379_vm3, %v1378_v9, 0.0 }
 0x2d0   : > { %v1380_v12 = vsel %vm1379_vm3, %v1377_v0, 0.0 }
 0x2d1   : > { %v1382_v14 = vadd.f32 %v1381_v2, %v1380_v12 }
 0x2d3   : > { %v1383_v15 = vrot.slane %v1382_v14, 4 }
 0x2d5   : > { %v1384_v16 = vadd.f32 %v1383_v15, %v1382_v14 }
 0x2d7   : > { %v1385_v59 = vrot.slane %v1384_v16, 2 }
 0x2d9   : > { %v1386_v17 = vadd.f32 %v1385_v59, %v1384_v16 }
 0x2db   : > { %v1387_v18 = vrot.slane %v1386_v17, 1 }
 0x2dd   : > { %v1388_v19 = vadd.f32 %v1387_v18, %v1386_v17 }
 0x2df   : > { %v1389_v20 = vmul.f32 0.0625, %v1388_v19 }
 0x2e1   : > { %1391 = vst.msk [vmem:[%s435_s9] sm:$0x1] %vm1390_vm4, %v1389_v20 }
 0x2e2   : > { %1825 = shalt.err (!%p1822_p5)
}
 0x2e3   : > { %s1826_s21 = scalar_lea.hbm %s1403_s16, 16  ;;  %s1830_s23 = scalar_lea.hbm %s2329_s7, 32 }
 0x2e4   : > { %p1827_p7 = scmp.ne.s32.totalorder %s1403_s16, %s1826_s21  ;;  %p1831_p12 = scmp.lt.s32.totalorder %s1403_s16, %s2329_s7 }
 0x2e5   : > { %p1832_p13 = scmp.lt.s32.totalorder %s1830_s23, %s1826_s21 }
 0x2e6   : > { %p1828_p10 = pnand %p1827_p7, %p1953_p6 }
 0x2e7   : > { %p1833_p0 = por %p1832_p13, %p1831_p12 }
 0x2e8   : > { %p1829_p11 = pneg %p1828_p10 }
 0x2ea   : > { %p1834_p9 = pnand %p1833_p0, %p1829_p11 }
 0x2ec   : > { %1837 = shalt.err (!%p1834_p9)
}
 0x2ed   : > { %1773 = dma.vmem_to_hbm [thread:$0]  (%p1953_p6), %s1406_s13, 16, %s1403_s16, %s1393_s17  }
 0x2ee PF: > { %s1417_s14 = sand.u32 1, %s1860_s24   ;;  %p2333_p1 = scmp.ge.s32.totalorder %s1872_s27, 2 }
 0x2ef   : > { %s1418_s15 = scalar_lea.sflag [#allocation4], %s1417_s14 }
 0x2f0   : > { %p1776_p2 = pnand %p2333_p1, %p1957_p8 }
 0x2f2   : > { %p1777_p3 = pneg %p1776_p2 }
 0x2f4   : > { %1855 = dma.done.wait (%p1777_p3), %s1418_s15, 16  }
 0x2f5   : > { %1857 = vsyncadd (%p1777_p3), %s1418_s15, 4294967280  ;;  %p17_p9 = scmp.ge.s32.totalorder %s1938_s30, 4   ;;  %s2334_s24 = smov %s1864_s25 }
 0x2f6   : > { %s2335_s25 = smov %s1868_s26  ;;  %s2336_s26 = smov %s1951_s10 }
 0x2f7   : > { %s2337_s27 = smov %s1938_s30  ;;  %19 = sbr.rel (!%p17_p9) target bundleno = 3 (0x3), region = 126 }
 0x2fc   :  { %1422 = vsyncpa [#allocation4], 1 }
 0x2fd   :  { %1424 = vsyncpa [#allocation4 + $0x1], 1 }

</bundles_post_ra>
